<compile_context>
chip_gen: v7x
topology: tpu7x:2x2x1
jax: 0.10.0
libtpu: 0.0.40
codegen_flags: <defaults>
</compile_context>

<pallas_src>
import functools

import jax
import jax.numpy as jnp
from jax.experimental import pallas as pl
from jax.experimental.pallas import tpu as pltpu

FEATURE_DIM = 20
PEMBED_DIMS = 12
IN_DIM = FEATURE_DIM + PEMBED_DIMS   # 32
H1_DIM = 64
HC_DIM = 128
OUT_DIM = 80 * 4                     # 320
KSIZE = 3

_LANE = 128
_DEFAULT_MAX_CHUNK = 512             # output frames per time chunk


def _cdiv(a, b):
    return -(-a // b)


def _round_up(x, m):
    return _cdiv(x, m) * m


def _lanes(c):
    return _round_up(c, _LANE)


def _chip_generation():
    """Best-effort TPU generation from device_kind; 0 if unknown."""
    try:
        kind = jax.devices()[0].device_kind.lower()
    except Exception:                                   # no device / interpret
        return 0
    if "v7" in kind or "tpu7" in kind or "7x" in kind:
        return 7
    if "v6" in kind:
        return 6
    if "v5" in kind:
        return 5
    if "v4" in kind:
        return 4
    return 0


def _vmem_plan(gen):
    """(per-step VMEM budget, vmem_limit_bytes) per chip generation."""
    if gen >= 7:            # 64 MiB physical per TC
        return 20 << 20, 32 << 20
    if gen == 6:            # 128 MiB physical, 32 MiB default scoped
        return 40 << 20, 64 << 20
    # v5e / unknown: tightest scoped default, lowest HBM BW — stay modest.
    return 12 << 20, 24 << 20


def _per_elem_vmem_bytes(tc, out_bytes):
    """Lane-padded VMEM footprint for one (pseudo-)batch element with `tc`
    output frames (`tc + 2` input frames); I/O counted double-buffered."""
    tm2 = tc + 2
    b = 0
    b += 2 * tm2 * _lanes(FEATURE_DIM) * 2       # feats block, 2 bufs, bf16
    b += 2 * tm2 * _lanes(PEMBED_DIMS) * 2       # pembed block, 2 bufs, bf16
    b += tm2 * _lanes(IN_DIM) * 2                # concat slab, bf16
    b += tm2 * _lanes(H1_DIM) * (4 + 2)          # dense1 f32 acc + h1 bf16
    b += KSIZE * tc * _lanes(H1_DIM) * 2         # conv tap slices (worst case)
    b += tc * _lanes(HC_DIM) * (4 + 2)           # conv f32 acc + hc bf16
    b += tc * _lanes(OUT_DIM) * 4                # dense2 f32 result
    b += 2 * tc * _lanes(OUT_DIM) * out_bytes    # output block, 2 bufs
    return b


def _cond_kernel(f_ref, p_ref, w1_ref, wc_ref, w2_ref, o_ref, *, bf16_act):
    # f_ref : (Bb, Tc+2, 20)  bf16   features slice
    # p_ref : (Bb, Tc+2, 12)  bf16   embedded period
    # w1_ref: (32, 64)        bf16   dense1 weight (in, out)
    # wc_ref: (3, 64, 128)    bf16   conv weight (tap, in, out)
    # w2_ref: (128, 320)      bf16   dense2 weight (in, out)
    # o_ref : (Bb, Tc, 320)   bf16 (default) or f32
    bb, tm2, _ = f_ref.shape
    tm4 = o_ref.shape[1]

    # ---- dense1: single K=32 dot on the in-VMEM (feat||pembed) slab,
    # flattened over batch*time so the MXU sees a large M.
    x = jnp.concatenate([f_ref[...], p_ref[...]], axis=-1)      # (Bb,Tc+2,32)
    x = x.reshape(bb * tm2, IN_DIM)
    a1 = jnp.dot(x, w1_ref[...], preferred_element_type=jnp.float32)
    if bf16_act:
        h1 = jnp.tanh(a1.astype(jnp.bfloat16))           # bf16 EUP (v6e/v7x)
    else:
        h1 = jnp.tanh(a1).astype(jnp.bfloat16)           # f32 EUP (v5e)
    h1 = h1.reshape(bb, tm2, H1_DIM)

    # ---- conv1d(k=3, 'valid'): 3 accumulated K=64 dots reading h1 in place
    # (no im2col lane concat).  Taps never cross (pseudo-)batch boundaries.
    acc = None
    for k in range(KSIZE):
        tap = h1[:, k:k + tm4, :].reshape(bb * tm4, H1_DIM)
        d = jnp.dot(tap, wc_ref[k], preferred_element_type=jnp.float32)
        acc = d if acc is None else acc + d
    if bf16_act:
        hc = jnp.tanh(acc.astype(jnp.bfloat16))
    else:
        hc = jnp.tanh(acc).astype(jnp.bfloat16)

    # ---- dense2 + final tanh (kept in f32; cast happens at the store) ------
    out = jnp.tanh(jnp.dot(hc, w2_ref[...], preferred_element_type=jnp.float32))
    o_ref[...] = out.reshape(bb, tm4, OUT_DIM).astype(o_ref.dtype)


def fargan_cond_pallas(features, period, params, *,
                       out_dtype=jnp.bfloat16,
                       block_b=None,
                       chunk_frames=None):
    """FARGANCond forward.

    features: (B, T, 20) f32; period: (B, T) int32.
    Returns (B, T-4, 320) in `out_dtype` (bf16 by default — the kernel is
    writeback-bound; pass out_dtype=jnp.float32 for the PyTorch dtype).
    """
    emb, w1, wc, w2 = (params["pembed"], params["w1"],
                       params["wconv"], params["w2"])
    B, T, _ = features.shape
    if T < 5:
        raise ValueError(f"FARGANCond needs T >= 5 (got T={T}): "
                         "conv1d(k=3, 'valid') would produce <= 0 frames.")
    Tm2, Tm4 = T - 2, T - 4

    gen = _chip_generation()
    bf16_act = gen >= 6               # v6e/v7x EUP has bf16 tanh; v5e does not
    budget, vmem_limit = _vmem_plan(gen)
    out_bytes = jnp.dtype(out_dtype).itemsize

    # ---- glue (plain JAX): slice, embedding gather, bf16 cast --------------
    feats = features[:, 2:, :].astype(jnp.bfloat16)              # (B, Tm2, 20)
    p = emb[period[:, 2:] - 32].astype(jnp.bfloat16)             # (B, Tm2, 12)

    # ---- time tiling: chunks of tc output frames (+2 halo), folded into batch
    if chunk_frames is None:
        tc = min(_round_up(Tm4, 16), _DEFAULT_MAX_CHUNK)
    else:
        tc = max(1, int(chunk_frames))
    nchunks = _cdiv(Tm4, tc)
    tin = nchunks * tc + 2
    if tin > Tm2:                                 # zero-pad time (sliced later)
        feats = jnp.pad(feats, ((0, 0), (0, tin - Tm2), (0, 0)))
        p = jnp.pad(p, ((0, 0), (0, tin - Tm2), (0, 0)))
    if nchunks > 1:
        win = jnp.arange(nchunks)[:, None] * tc + jnp.arange(tc + 2)[None, :]
        feats = feats[:, win, :].reshape(B * nchunks, tc + 2, FEATURE_DIM)
        p = p[:, win, :].reshape(B * nchunks, tc + 2, PEMBED_DIMS)
    n_elems = B * nchunks

    # ---- batch block size from a lane-padded VMEM estimate -----------------
    per_elem = _per_elem_vmem_bytes(tc, out_bytes)
    if block_b is None:
        bb = max(1, min(n_elems, (budget - (1 << 20)) // per_elem))
        if n_elems >= 2:                          # keep >=2 grid steps (pipeline)
            bb = min(bb, _cdiv(n_elems, 2))
    else:
        bb = max(1, int(block_b))
    n_pad = _round_up(n_elems, bb)
    if n_pad > n_elems:                           # no garbage rows in last block
        feats = jnp.pad(feats, ((0, n_pad - n_elems), (0, 0), (0, 0)))
        p = jnp.pad(p, ((0, n_pad - n_elems), (0, 0), (0, 0)))

    # ---- weights: bf16 inputs to the MXU ------------------------------------
    w1b = w1.astype(jnp.bfloat16)                 # (32, 64)
    wcb = wc.astype(jnp.bfloat16)                 # (3, 64, 128)
    w2b = w2.astype(jnp.bfloat16)                 # (128, 320)

    grid = (n_pad // bb,)
    out = pl.pallas_call(
        functools.partial(_cond_kernel, bf16_act=bf16_act),
        out_shape=jax.ShapeDtypeStruct((n_pad, tc, OUT_DIM), out_dtype),
        grid_spec=pltpu.PrefetchScalarGridSpec(
            num_scalar_prefetch=0,
            grid=grid,
            in_specs=[
                pl.BlockSpec((bb, tc + 2, FEATURE_DIM), lambda b: (b, 0, 0)),
                pl.BlockSpec((bb, tc + 2, PEMBED_DIMS), lambda b: (b, 0, 0)),
                pl.BlockSpec((IN_DIM, H1_DIM), lambda b: (0, 0)),
                pl.BlockSpec((KSIZE, H1_DIM, HC_DIM), lambda b: (0, 0, 0)),
                pl.BlockSpec((HC_DIM, OUT_DIM), lambda b: (0, 0)),
            ],
            out_specs=pl.BlockSpec((bb, tc, OUT_DIM), lambda b: (b, 0, 0)),
        ),
        compiler_params=pltpu.CompilerParams(
            dimension_semantics=("parallel",),
            vmem_limit_bytes=vmem_limit),
    )(feats, p, w1b, wcb, w2b)

    out = out[:n_elems].reshape(B, nchunks * tc, OUT_DIM)[:, :Tm4, :]
    return out


def init_params(key):
    """Deterministic synthetic weights matching the PyTorch module shapes."""
    k0, k1, k2, k3 = jax.random.split(key, 4)
    # nn.Embedding(224, 12)
    pembed = jax.random.normal(k0, (224, PEMBED_DIMS), jnp.float32) * 0.1
    # nn.Linear(32, 64, bias=False): PyTorch weight (64, 32); store (32, 64).
    w1 = jax.random.normal(k1, (IN_DIM, H1_DIM), jnp.float32) * 0.1
    # nn.Conv1d(64, 128, k=3, bias=False): PyTorch weight (128, 64, 3);
    # store as (k, in, out).
    wconv = jax.random.normal(k2, (KSIZE, H1_DIM, HC_DIM), jnp.float32) * 0.05
    # nn.Linear(128, 320, bias=False): PyTorch weight (320, 128); store (128, 320).
    w2 = jax.random.normal(k3, (HC_DIM, OUT_DIM), jnp.float32) * 0.05
    return {"pembed": pembed, "w1": w1, "wconv": wconv, "w2": w2}


def fargan_cond_ref(features, period, params):
    """Pure-JAX f32 reference mirroring the PyTorch forward."""
    emb, w1, wc, w2 = (params["pembed"], params["w1"],
                       params["wconv"], params["w2"])
    feats = features[:, 2:, :]
    per = period[:, 2:] - 32
    x = jnp.concatenate([feats, emb[per]], axis=-1)
    h1 = jnp.tanh(x @ w1)                               # (B, Tm2, 64)
    Tm4 = h1.shape[1] - 2
    hc = (h1[:, 0:Tm4] @ wc[0]
          + h1[:, 1:Tm4 + 1] @ wc[1]
          + h1[:, 2:Tm4 + 2] @ wc[2])
    hc = jnp.tanh(hc)                                   # (B, Tm4, 128)
    return jnp.tanh(hc @ w2)                            # (B, Tm4, 320)


if __name__ == "__main__":
    key = jax.random.PRNGKey(0)
    kp, kf, kper = jax.random.split(key, 3)
    params = init_params(kp)

    # Primary small-shape check.
    B, T = 2, 8
    features = jax.random.normal(kf, (B, T, FEATURE_DIM), jnp.float32)
    period = jax.random.randint(kper, (B, T), 32, 32 + 224, dtype=jnp.int32)
    out = jax.block_until_ready(fargan_cond_pallas(features, period, params))
    ref = fargan_cond_ref(features, period, params)
    assert out.shape == (B, T - 4, OUT_DIM), out.shape
    # bf16 matmul inputs + bf16 activations/output (f32 accumulation) vs f32 ref.
    err = float(jnp.max(jnp.abs(out.astype(jnp.float32) - ref)))
    assert err < 5e-2, err

    # Secondary check: odd batch + multi-chunk time-tiling path.
    B2, T2 = 3, 40
    f2 = jax.random.normal(jax.random.PRNGKey(1), (B2, T2, FEATURE_DIM),
                           jnp.float32)
    per2 = jax.random.randint(jax.random.PRNGKey(2), (B2, T2), 32, 32 + 224,
                              dtype=jnp.int32)
    out2 = jax.block_until_ready(
        fargan_cond_pallas(f2, per2, params, chunk_frames=16))
    ref2 = fargan_cond_ref(f2, per2, params)
    assert out2.shape == ref2.shape, (out2.shape, ref2.shape)
    err2 = float(jnp.max(jnp.abs(out2.astype(jnp.float32) - ref2)))
    assert err2 < 5e-2, err2

    print("KERNEL_OK")
</pallas_src>

<mosaic_0001>
module attributes {stable_mosaic.version = 11 : i64} {
  func.func @_cond_kernel(%arg0: i32, %arg1: memref<1x18x20xbf16, #tpu.memory_space<vmem>>, %arg2: memref<1x18x12xbf16, #tpu.memory_space<vmem>>, %arg3: memref<32x64xbf16, #tpu.memory_space<vmem>>, %arg4: memref<3x64x128xbf16, #tpu.memory_space<vmem>>, %arg5: memref<128x320xbf16, #tpu.memory_space<vmem>>, %arg6: memref<1x16x320xbf16, #tpu.memory_space<vmem>>) attributes {dimension_semantics = [#tpu.dimension_semantics<parallel>], iteration_bounds = array<i64: 2>, scalar_prefetch = 0 : i64, scratch_operands = 0 : i64, tpu.core_type = #tpu.core_type<tc>, window_params = [{transform_indices = @transform_0, window_bounds = array<i64: 1, 18, 20>}, {transform_indices = @transform_1, window_bounds = array<i64: 1, 18, 12>}, {pipeline_mode = #tpu.pipeline_mode<synchronous>, transform_indices = @transform_2, window_bounds = array<i64: 32, 64>}, {pipeline_mode = #tpu.pipeline_mode<synchronous>, transform_indices = @transform_3, window_bounds = array<i64: 3, 64, 128>}, {pipeline_mode = #tpu.pipeline_mode<synchronous>, transform_indices = @transform_4, window_bounds = array<i64: 128, 320>}, {transform_indices = @transform_5, window_bounds = array<i64: 1, 16, 320>}]} {
    %c0 = arith.constant 0 : index
    %c0_0 = arith.constant 0 : index
    %c0_1 = arith.constant 0 : index
    %0 = vector.load %arg1[%c0, %c0_0, %c0_1] : memref<1x18x20xbf16, #tpu.memory_space<vmem>>, vector<1x18x20xbf16>
    %c0_2 = arith.constant 0 : index
    %c0_3 = arith.constant 0 : index
    %c0_4 = arith.constant 0 : index
    %1 = vector.load %arg2[%c0_2, %c0_3, %c0_4] : memref<1x18x12xbf16, #tpu.memory_space<vmem>>, vector<1x18x12xbf16>
    %2 = tpu.concatenate %0, %1 in 2 : vector<1x18x20xbf16>, vector<1x18x12xbf16> -> vector<1x18x32xbf16>
    %3 = vector.shape_cast %2 : vector<1x18x32xbf16> to vector<18x32xbf16>
    %c0_5 = arith.constant 0 : index
    %c0_6 = arith.constant 0 : index
    %4 = vector.load %arg3[%c0_5, %c0_6] : memref<32x64xbf16, #tpu.memory_space<vmem>>, vector<32x64xbf16>
    %cst = arith.constant dense<0.000000e+00> : vector<18x64xf32>
    %5 = tpu.matmul %3, %4, %cst {dimension_numbers = #tpu.dot_dimension_numbers<[1], [0], [0], [1], [0, 0, 1, 1], [], []>} : vector<18x32xbf16>, vector<32x64xbf16>, vector<18x64xf32> -> vector<18x64xf32>
    %6 = math.tanh %5 : vector<18x64xf32>
    %7 = arith.truncf %6 : vector<18x64xf32> to vector<18x64xbf16>
    %8 = vector.shape_cast %7 : vector<18x64xbf16> to vector<1x18x64xbf16>
    %9 = vector.extract_strided_slice %8 {offsets = [0, 0, 0], sizes = [1, 16, 64], strides = [1, 1, 1]} : vector<1x18x64xbf16> to vector<1x16x64xbf16>
    %10 = vector.shape_cast %9 : vector<1x16x64xbf16> to vector<16x64xbf16>
    %c0_7 = arith.constant 0 : index
    %c0_8 = arith.constant 0 : index
    %c0_9 = arith.constant 0 : index
    %11 = vector.load %arg4[%c0_7, %c0_8, %c0_9] : memref<3x64x128xbf16, #tpu.memory_space<vmem>>, vector<1x64x128xbf16>
    %12 = vector.shape_cast %11 : vector<1x64x128xbf16> to vector<64x128xbf16>
    %cst_10 = arith.constant dense<0.000000e+00> : vector<16x128xf32>
    %13 = tpu.matmul %10, %12, %cst_10 {dimension_numbers = #tpu.dot_dimension_numbers<[1], [0], [0], [1], [0, 0, 1, 1], [], []>} : vector<16x64xbf16>, vector<64x128xbf16>, vector<16x128xf32> -> vector<16x128xf32>
    %14 = vector.extract_strided_slice %8 {offsets = [0, 1, 0], sizes = [1, 16, 64], strides = [1, 1, 1]} : vector<1x18x64xbf16> to vector<1x16x64xbf16>
    %15 = vector.shape_cast %14 : vector<1x16x64xbf16> to vector<16x64xbf16>
    %c1 = arith.constant 1 : index
    %c0_11 = arith.constant 0 : index
    %c0_12 = arith.constant 0 : index
    %16 = vector.load %arg4[%c1, %c0_11, %c0_12] : memref<3x64x128xbf16, #tpu.memory_space<vmem>>, vector<1x64x128xbf16>
    %17 = vector.shape_cast %16 : vector<1x64x128xbf16> to vector<64x128xbf16>
    %cst_13 = arith.constant dense<0.000000e+00> : vector<16x128xf32>
    %18 = tpu.matmul %15, %17, %cst_13 {dimension_numbers = #tpu.dot_dimension_numbers<[1], [0], [0], [1], [0, 0, 1, 1], [], []>} : vector<16x64xbf16>, vector<64x128xbf16>, vector<16x128xf32> -> vector<16x128xf32>
    %19 = arith.addf %13, %18 : vector<16x128xf32>
    %20 = vector.extract_strided_slice %8 {offsets = [0, 2, 0], sizes = [1, 16, 64], strides = [1, 1, 1]} : vector<1x18x64xbf16> to vector<1x16x64xbf16>
    %21 = vector.shape_cast %20 : vector<1x16x64xbf16> to vector<16x64xbf16>
    %c2 = arith.constant 2 : index
    %c0_14 = arith.constant 0 : index
    %c0_15 = arith.constant 0 : index
    %22 = vector.load %arg4[%c2, %c0_14, %c0_15] : memref<3x64x128xbf16, #tpu.memory_space<vmem>>, vector<1x64x128xbf16>
    %23 = vector.shape_cast %22 : vector<1x64x128xbf16> to vector<64x128xbf16>
    %cst_16 = arith.constant dense<0.000000e+00> : vector<16x128xf32>
    %24 = tpu.matmul %21, %23, %cst_16 {dimension_numbers = #tpu.dot_dimension_numbers<[1], [0], [0], [1], [0, 0, 1, 1], [], []>} : vector<16x64xbf16>, vector<64x128xbf16>, vector<16x128xf32> -> vector<16x128xf32>
    %25 = arith.addf %19, %24 : vector<16x128xf32>
    %26 = math.tanh %25 : vector<16x128xf32>
    %27 = arith.truncf %26 : vector<16x128xf32> to vector<16x128xbf16>
    %c0_17 = arith.constant 0 : index
    %c0_18 = arith.constant 0 : index
    %28 = vector.load %arg5[%c0_17, %c0_18] : memref<128x320xbf16, #tpu.memory_space<vmem>>, vector<128x320xbf16>
    %cst_19 = arith.constant dense<0.000000e+00> : vector<16x320xf32>
    %29 = tpu.matmul %27, %28, %cst_19 {dimension_numbers = #tpu.dot_dimension_numbers<[1], [0], [0], [1], [0, 0, 1, 1], [], []>} : vector<16x128xbf16>, vector<128x320xbf16>, vector<16x320xf32> -> vector<16x320xf32>
    %30 = math.tanh %29 : vector<16x320xf32>
    %31 = vector.shape_cast %30 : vector<16x320xf32> to vector<1x16x320xf32>
    %32 = arith.truncf %31 : vector<1x16x320xf32> to vector<1x16x320xbf16>
    %c0_20 = arith.constant 0 : index
    %c0_21 = arith.constant 0 : index
    %c0_22 = arith.constant 0 : index
    %33 = vector.load %arg6[%c0_20, %c0_21, %c0_22] : memref<1x16x320xbf16, #tpu.memory_space<vmem>>, vector<1x16x320xbf16>
    tpu.vector_store %arg6[%c0_20, %c0_21, %c0_22], %32 {strides = array<i32>} : memref<1x16x320xbf16, #tpu.memory_space<vmem>>, vector<1x16x320xbf16>,
    return
  }
  func.func @transform_0(%arg0: i32) -> (i32, i32, i32) {
    %c0_i32 = arith.constant 0 : i32
    %c0_i32_0 = arith.constant 0 : i32
    %c0_i32_1 = arith.constant 0 : i32
    return %arg0, %c0_i32, %c0_i32_0 : i32, i32, i32
  }
  func.func @transform_1(%arg0: i32) -> (i32, i32, i32) {
    %c0_i32 = arith.constant 0 : i32
    %c0_i32_0 = arith.constant 0 : i32
    %c0_i32_1 = arith.constant 0 : i32
    return %arg0, %c0_i32, %c0_i32_0 : i32, i32, i32
  }
  func.func @transform_2(%arg0: i32) -> (i32, i32) {
    %c0_i32 = arith.constant 0 : i32
    %c0_i32_0 = arith.constant 0 : i32
    %c0_i32_1 = arith.constant 0 : i32
    return %c0_i32, %c0_i32_0 : i32, i32
  }
  func.func @transform_3(%arg0: i32) -> (i32, i32, i32) {
    %c0_i32 = arith.constant 0 : i32
    %c0_i32_0 = arith.constant 0 : i32
    %c0_i32_1 = arith.constant 0 : i32
    %c0_i32_2 = arith.constant 0 : i32
    return %c0_i32, %c0_i32_0, %c0_i32_1 : i32, i32, i32
  }
  func.func @transform_4(%arg0: i32) -> (i32, i32) {
    %c0_i32 = arith.constant 0 : i32
    %c0_i32_0 = arith.constant 0 : i32
    %c0_i32_1 = arith.constant 0 : i32
    return %c0_i32, %c0_i32_0 : i32, i32
  }
  func.func @transform_5(%arg0: i32) -> (i32, i32, i32) {
    %c0_i32 = arith.constant 0 : i32
    %c0_i32_0 = arith.constant 0 : i32
    %c0_i32_1 = arith.constant 0 : i32
    return %arg0, %c0_i32, %c0_i32_0 : i32, i32, i32
  }
}

</mosaic_0001>

<bundles_post_ra>
// kernel: tpu_custom_call.1
= control target key start
LH: loop header
LB: loop body
LE: loop exit
PB: predicated region body
PF: predicated region fallthrough
CT: control target
= control target key end

     0   :  { %10 = vsyncpa [#allocation3], 0  ;;  %s1620_s0 = inlined_call_operand.vmem [shape: bf16[2,18,20], index: 0, kind: input, shape index: {}]   ;;  %s1621_s1 = inlined_call_operand.vmem [shape: bf16[2,18,12], index: 1, kind: input, shape index: {}]   ;;  %s1622_s2 = inlined_call_operand.vmem [shape: bf16[32,64], index: 2, kind: input, shape index: {}]   ;;  %s1623_s3 = inlined_call_operand.vmem [shape: bf16[3,64,128], index: 3, kind: input, shape index: {}]   ;;  %s1624_s4 = inlined_call_operand.vmem [shape: bf16[128,320], index: 4, kind: input, shape index: {}]   ;;  %s1625_s5 = inlined_call_operand.hbm [shape: bf16[2,16,320], index: 5, kind: output, shape index: {}]  }
   0x1   :  { %12 = vsyncpa [#allocation3 + $0x1], 0  ;;  %s1369_s18 = smov 0   ;;  %s1371_s19 = smov 0  }
   0x2   :  { %s1373_s20 = smov 0   ;;  %s1375_s21 = smov 0  }
   0x3 LB: > { %s1390_s22 = sadd.s32 4294967295, %s1330_s21   ;;  %s968_s23 = sadd.s32 4294967294, %s1330_s21   ;;  %s1330_s21 = sphi %s1375_s21, %s1631_s21   ;;  %s1326_s20 = sphi %s1373_s20, %s1630_s20   ;;  %s1322_s19 = sphi %s1371_s19, %s1629_s19   ;;  %s1318_s18 = sphi %s1369_s18, %s1628_s18  }
   0x4   : > { %s1394_s24 = sadd.s32 1, %s1330_s21   ;;  %s140_s25 = sadd.s32 1, %s1326_s20 }
   0x5   : > { %s137_s26 = ssub.s32 %s1330_s21, %s1394_s24  ;;  %p150_p0 = scmp.ne.s32.totalorder %s1326_s20, %s1322_s19 }
   0x6   : > { %p138_p1 = scmp.eq.s32.totalorder %s137_s26, 0  ;;  %p151_p2 = scmp.eq.s32.totalorder %s1390_s22, 1 }
   0x7   : > { %p156_p3 = scmp.ne.s32.totalorder %s1322_s19, %s1318_s18  ;;  %p157_p4 = scmp.eq.s32.totalorder %s968_s23, 1 }
   0x8   : > { %s1405_s27 = scalar_select %p138_p1, %s1326_s20, %s140_s25  }
   0x9   : > { %p1407_p5 = por %p151_p2, %p150_p0  ;;  %p1411_p6 = por %p157_p4, %p156_p3 }
   0xa   : > { %p971_p7 = scmp.ge.s32.totalorder %s1330_s21, 1  ;;  %p200_p8 = scmp.lt.s32.totalorder %s1330_s21, 3 }
   0xc   : > { %p201_p9 = pnand %p971_p7, %p200_p8 }
   0xd   : > { %p233_p10 = scmp.lt.s32.totalorder (!%p201_p9), %s1390_s22, 1  ;;  %v1198_v0 = vld [vmem:[%s1622_s2] sm:$0xff] (!%p201_p9)   ;;  %v1199_v1 = vld [vmem:[%s1622_s2 + $0x8] sm:$0xff] (!%p201_p9)   ;;  %s1332_s17 = smov (!%p201_p9), 20   ;;  %vm270_vm0 = vcmask (!%p201_p9), 162816   ;;  %vm293_vm1 = vcmask (!%p201_p9), 261120  }
   0xe   : > { %204 = sbr.rel (%p201_p9) target bundleno = 915 (0x393), region = 40  ;;  %1076 = vmatprep.subr.bf16.mxu1 (!%p201_p9), %v1198_v0  ;;  %v1202_v10 = vld [vmem:[%s1623_s3 + $0x20] sm:$0xff] (!%p201_p9)   ;;  %v1333_v11 = vmov (!%p201_p9), 0.0   ;;  %v1203_v12 = vld [vmem:[%s1623_s3 + $0x28] sm:$0xff] (!%p201_p9)   ;;  %v1204_v13 = vld [vmem:[%s1623_s3 + $0x30] sm:$0xff] (!%p201_p9)   ;;  %vm1334_vm2 = vmmov (!%p201_p9), 0  }
   0xf   : > { %1077 = vmatpush3.bf16.msra.mxu1 (!%p201_p9), %v1198_v0  ;;  %v1205_v14 = vld [vmem:[%s1623_s3 + $0x38] sm:$0xff] (!%p201_p9)   ;;  %v1214_v15 = vld [vmem:[%s1624_s4 + $0x4] ss:$12 sps:$4 sm:$0xff] (!%p201_p9)   ;;  %v1216_v16 = vld [vmem:[%s1624_s4] ss:$12 sps:$4 sm:$0xff] (!%p201_p9)   ;;  %vm528_vm3 = vcmask (!%p201_p9), 1046528  }
  0x10   : > { %1078 = vmatprep.subr.bf16.mxu1 (!%p201_p9), %v1199_v1  ;;  %v1217_v17 = vld [vmem:[%s1624_s4 + $0x1c] ss:$12 sps:$4 sm:$0xff] (!%p201_p9)   ;;  %765 = vmatprep.subr.bf16.mxu0 (!%p201_p9), %v1214_v15  ;;  %v1219_v18 = vld [vmem:[%s1624_s4 + $0x18] ss:$12 sps:$4 sm:$0xff] (!%p201_p9)   ;;  %v1220_v19 = vld [vmem:[%s1624_s4 + $0x34] ss:$12 sps:$4 sm:$0xff] (!%p201_p9)  }
  0x11   : > { %766 = vmatpush1.bf16.msra.mxu0 (!%p201_p9), %v1216_v16  ;;  %v1222_v20 = vld [vmem:[%s1624_s4 + $0x30] ss:$12 sps:$4 sm:$0xff] (!%p201_p9)   ;;  %v1223_v21 = vld [vmem:[%s1624_s4 + $0x4c] ss:$12 sps:$4 sm:$0xff] (!%p201_p9)   ;;  %v1225_v22 = vld [vmem:[%s1624_s4 + $0x48] ss:$12 sps:$4 sm:$0xff] (!%p201_p9)  }
  0x12   : > { %767 = vmatprep.subr.bf16.mxu0 (!%p201_p9), %v1217_v17  ;;  %v1226_v23 = vld [vmem:[%s1624_s4 + $0x64] ss:$12 sps:$4 sm:$0xff] (!%p201_p9)   ;;  %vm368_vm4 = vsmask.f32 (!%p201_p9), 7424  ;;  %vm405_vm5 = vcmask (!%p201_p9), 523264   ;;  %v1207_v44 = vld [vmem:[%s1623_s3 + $0x8] sm:$0xff] (!%p201_p9)  }
  0x13   : > { %1079 = vmatpush3.bf16.msra.mxu1 (!%p201_p9), %v1199_v1  ;;  %v1206_v42 = vld [vmem:[%s1623_s3] sm:$0xff] (!%p201_p9)   ;;  %v1208_v45 = vld [vmem:[%s1623_s3 + $0x10] sm:$0xff] (!%p201_p9)   ;;  %v1209_v46 = vld [vmem:[%s1623_s3 + $0x18] sm:$0xff] (!%p201_p9)   ;;  %v1335_v57 = vmov (!%p201_p9), 0   ;;  %vm876_vm6 = vcmask (!%p201_p9), 519168   ;;  %s1336_s25 = smov (!%p201_p9), [#allocation2]  }
  0x14   : > { %1084 = vmatprep.subr.bf16.mxu1 (!%p201_p9), %v1333_v11  ;;  %v1210_v47 = vld [vmem:[%s1623_s3 + $0x40] sm:$0xff] (!%p201_p9)   ;;  %v1211_v48 = vld [vmem:[%s1623_s3 + $0x48] sm:$0xff] (!%p201_p9)   ;;  %v1212_v49 = vld [vmem:[%s1623_s3 + $0x50] sm:$0xff] (!%p201_p9)   ;;  %797 = vmatprep.mubr.bf16.mxu0 (!%p201_p9), %v1335_v57  ;;  %s1272_s26 = sshll.u32 (!%p201_p9), %s1336_s25, 4  ;;  %s1273_s26 = int_to_ptr.vmem [resolvable:$false] %s1272_s26 }
  0x15   : > { %s234_s7 = scalar_select %p233_p10, %s1390_s22, 1  ;;  %768 = vmatpush1.bf16.msra.mxu0 %v1219_v18  ;;  %v1213_v50 = vld [vmem:[%s1623_s3 + $0x58] sm:$0xff]   ;;  %v1228_v51 = vld [vmem:[%s1624_s4 + $0x60] ss:$12 sps:$4 sm:$0xff]   ;;  %v1237_v58 = vld [vmem:[%s1624_s4 + $0xa8] ss:$12 sps:$4 sm:$0xff]  }
  0x16   : > { %769 = vmatprep.subr.bf16.mxu0 %v1220_v19  ;;  %v1229_v52 = vld [vmem:[%s1624_s4 + $0x7c] ss:$12 sps:$4 sm:$0xff]   ;;  %v1231_v53 = vld [vmem:[%s1624_s4 + $0x78] ss:$12 sps:$4 sm:$0xff]   ;;  %v1232_v54 = vld [vmem:[%s1624_s4 + $0x94] ss:$12 sps:$4 sm:$0xff]  }
  0x17   : > { %s1149_s10 = smul.u32 12, %s234_s7  ;;  %v1234_v55 = vld [vmem:[%s1624_s4 + $0x90] ss:$12 sps:$4 sm:$0xff]   ;;  %v1235_v56 = vld [vmem:[%s1624_s4 + $0xac] ss:$12 sps:$4 sm:$0xff]   ;;  %s1274_s30 = scalar_lea.vmem %s1273_s26, 768 }
  0x18   : > { %v1238_v1 = vld [vmem:[%s1624_s4 + $0x8] ss:$12 sps:$4 sm:$0xff]  }
  0x19   : > { %s242_s13 = scalar_lea.vmem %s1621_s1, %s1149_s10  ;;  %s237_s16 = scalar_lea.vmem %s1620_s0, %s1149_s10  ;;  %770 = vmatpush1.bf16.msra.mxu0 %v1222_v20 }
  0x1a   : > { %v1196_v2 = vld [vmem:[%s242_s13] sm:$0xff]   ;;  %v1197_v3 = vld [vmem:[%s242_s13 + $0x8] ss:$0 sps:$4 sm:$0x11]   ;;  %771 = vmatprep.subr.bf16.mxu0 %v1223_v21  ;;  %s230_s10 = sand.u32 1, %s1322_s19   ;;  %s1150_s13 = smul.u32 384, %s1390_s22 }
  0x1b   : > { %266 = vrot.lane.b32.xlu0 %v1196_v2, %s1332_s17  ;;  %v1200_v4 = vld [vmem:[%s237_s16] sm:$0xff]   ;;  %v1201_v7 = vld [vmem:[%s237_s16 + $0x8] ss:$0 sps:$4 sm:$0x11]   ;;  %s1148_s11 = smul.u32 24, %s230_s10  ;;  %s1579_s23 = scalar_lea.sflag [#allocation3], %s230_s10 }
  0x1d   : > { %772 = vmatpush1.bf16.msra.mxu0 %v1225_v22  ;;  %s232_s12 = scalar_lea.vmem [#allocation2], %s1148_s11 }
  0x1e   : > { %773 = vmatprep.subr.bf16.mxu0 %v1226_v23  ;;  %s894_s14 = sshll.u32 %s232_s12, 4  ;;  %s1577_s14 = int_to_ptr.vmem [resolvable:$true] %s894_s14 }
  0x1f   : > { %268 = vrot.lane.b32.xlu0 %v1197_v3, %s1332_s17  ;;  %v1239_v3 = vld [vmem:[%s1624_s4 + $0x20] ss:$12 sps:$4 sm:$0xff]   ;;  %s1575_s17 = scalar_lea.hbm %s1625_s5, %s1150_s13  ;;  %s1268_s22 = scalar_lea.vmem %s1577_s14, 384 }
  0x20   : > { %p1269_p11 = scmp.ne.s32.totalorder %s1577_s14, %s1268_s22  ;;  %p1275_p0 = scmp.lt.s32.totalorder %s1577_s14, %s1273_s26 }
  0x21   : > { %774 = vmatpush1.bf16.msra.mxu0 %v1228_v51  ;;  %p1276_p1 = scmp.lt.s32.totalorder %s1274_s30, %s1268_s22 }
  0x22   : > { %775 = vmatprep.subr.bf16.mxu0 %v1229_v52  ;;  %p1270_p12 = pnand %p1269_p11, %p1407_p5 }
  0x23   : > { %p1277_p2 = por %p1276_p1, %p1275_p0 }
  0x24   : > { %p1271_p13 = pneg %p1270_p12 }
  0x25   : > { %776 = vmatpush1.bf16.msra.mxu0 %v1231_v53 }
  0x26   : > { %777 = vmatprep.subr.bf16.mxu0 %v1232_v54  ;;  %p1278_p3 = pnand %p1277_p2, %p1271_p13 }
  0x29   : > { %778 = vmatpush1.bf16.msra.mxu0 %v1234_v55 }
  0x2a   : > { %779 = vmatprep.subr.bf16.mxu0 %v1235_v56 }
  0x2d   : > { %780 = vmatpush1.bf16.msra.mxu0 %v1237_v58 }
  0x2e   : > { %1120 = vmatprep.subr.bf16.mxu0 %v1333_v11 }
  0x8d   : > { %v267_v5 = vpop.permute.xlu0 %266 }
  0x8e   : > { %v273_v6 = vsel %vm270_vm0, %v1200_v4, %v267_v5  ;;  %v1240_v4 = vld [vmem:[%s1624_s4 + $0x38] ss:$12 sps:$4 sm:$0xff]   ;;  %v1241_v5 = vld [vmem:[%s1624_s4 + $0x50] ss:$12 sps:$4 sm:$0xff]  }
  0x8f   : > { %1080 = vmatprep.mubr.msk.bf16.mxu1 %vm293_vm1, %v273_v6  ;;  %v1242_v6 = vld [vmem:[%s1624_s4 + $0x68] ss:$12 sps:$4 sm:$0xff]  }
  0x91   : > { %v269_v8 = vpop.permute.xlu0 %268 }
  0x92   : > { %v276_v9 = vsel %vm270_vm0, %v1201_v7, %v269_v8  ;;  %v1243_v7 = vld [vmem:[%s1624_s4 + $0x80] ss:$12 sps:$4 sm:$0xff]   ;;  %v1244_v8 = vld [vmem:[%s1624_s4 + $0x98] ss:$12 sps:$4 sm:$0xff]  }
  0x93   : > { %1081 = vmatmul.mubr.msk.bf16.vlgmr.msra.gmra.mrb[0].mxu1 %vm293_vm1, %v276_v9  ;;  %v1245_v9 = vld [vmem:[%s1624_s4 + $0xb0] ss:$12 sps:$4 sm:$0xff]  }
  0x94   : > { %1085 = vmatpush3.bf16.msra.mxu1 %v1202_v10  ;;  %1092 = vmatprep.mubr.msk.bf16.mxu1 %vm1334_vm2, %v1333_v11 }
  0x95   : > { %1086 = vmatprep.subr.bf16.mxu1 %v1333_v11 }
  0x98   : > { %1087 = vmatpush3.bf16.msra.mxu1 %v1203_v12 }
  0x99   : > { %1088 = vmatprep.subr.bf16.mxu1 %v1333_v11 }
  0x9c   : > { %1089 = vmatpush3.bf16.msra.mxu1 %v1204_v13 }
  0x9d   : > { %1090 = vmatprep.subr.bf16.mxu1 %v1333_v11 }
  0xa0   : > { %1091 = vmatpush3.bf16.msra.mxu1 %v1205_v14 }
  0xa1   : > { %1096 = vmatprep.subr.bf16.mxu1 %v1333_v11 }
 0x166   : > { %v1082_v24 = vpop.f32.mrb[0].mxu1 }
 0x167   : > { %1246 = vtanh.f32 %v1082_v24  ;;  %v332_v25 = vpop.f32.mrb[1].mxu1 }
 0x168   : > { %v1083_v26 = vpop.f32.mrb[2].mxu1  ;;  %1248 = vtanh.f32 %v332_v25 }
 0x169   : > { %v335_v27 = vpop.f32.mrb[3].mxu1 }
 0x16a   : > { %1250 = vtanh.f32 %v335_v27 }
 0x171   : > { %v1247_v28 = vpop.eup %1246 }
 0x172   : > { %v1249_v29 = vpop.eup %1248  ;;  %v350_v30 = vpack.c.bf16 %v1247_v28, %v1247_v28 }
 0x174   : > { %v1251_v31 = vpop.eup %1250  ;;  %v377_v33 = vshll.u32 %v350_v30, 16  ;;  %v530_v34 = vrot.slane %v350_v30, 1 }
 0x175   : > { %v349_v32 = vpack.c.bf16 %v1251_v31, %v1249_v29 }
 0x176   : > { %v379_v40 = vrot.slane %v377_v33, 1 }
 0x177   : > { %v372_v35 = vshll.u32 %v349_v32, 16  ;;  %v529_v36 = vrot.slane %v349_v32, 1  ;;  %v370_v37 = vshrl.u32 %v349_v32, 16 }
 0x179   : > { %v374_v38 = vrot.slane %v372_v35, 1  ;;  %v531_v39 = vsel %vm528_vm3, %v529_v36, %v530_v34 }
 0x17b   : > { %v375_v41 = vor.u32 %v374_v38, %v370_v37 }
 0x17d   : > { %v380_v43 = vsel %vm368_vm4, %v375_v41, %v379_v40 }
 0x17e   : > { %1093 = vmatmul.mubr.msk.bf16.vlgmr.msra.gmra.mrb[4].mxu1 %vm405_vm5, %v380_v43 }
 0x17f   : > { %1097 = vmatpush3.bf16.msra.mxu1 %v1206_v42  ;;  %1104 = vmatprep.mubr.msk.bf16.mxu1 %vm1334_vm2, %v1333_v11 }
 0x180   : > { %1098 = vmatprep.subr.bf16.mxu1 %v1333_v11 }
 0x183   : > { %1099 = vmatpush3.bf16.msra.mxu1 %v1207_v44 }
 0x184   : > { %1100 = vmatprep.subr.bf16.mxu1 %v1333_v11 }
 0x187   : > { %1101 = vmatpush3.bf16.msra.mxu1 %v1208_v45 }
 0x188   : > { %1102 = vmatprep.subr.bf16.mxu1 %v1333_v11 }
 0x18b   : > { %1103 = vmatpush3.bf16.msra.mxu1 %v1209_v46 }
 0x18c   : > { %1108 = vmatprep.subr.bf16.mxu1 %v1333_v11 }
 0x18e   : > { %1105 = vmatmul.mubr.msk.bf16.vlgmr.msra.gmra.mrb[4].mxu1 %vm405_vm5, %v349_v32 }
 0x18f   : > { %1109 = vmatpush3.bf16.msra.mxu1 %v1210_v47  ;;  %1116 = vmatprep.mubr.msk.bf16.mxu1 %vm1334_vm2, %v1333_v11 }
 0x190   : > { %1110 = vmatprep.subr.bf16.mxu1 %v1333_v11 }
 0x193   : > { %1111 = vmatpush3.bf16.msra.mxu1 %v1211_v48 }
 0x194   : > { %1112 = vmatprep.subr.bf16.mxu1 %v1333_v11 }
 0x197   : > { %1113 = vmatpush3.bf16.msra.mxu1 %v1212_v49 }
 0x198   : > { %1114 = vmatprep.subr.bf16.mxu1 %v1333_v11 }
 0x19b   : > { %1115 = vmatpush3.bf16.msra.mxu1 %v1213_v50 }
 0x19e   : > { %1117 = vmatmul.mubr.msk.bf16.vlgmr.msra.gmra.mrb[4].mxu1 %vm405_vm5, %v531_v39 }
 0x271   : > { %v593_v59 = vpop.f32.mrb[4].mxu1 }
 0x272   : > { %v1118_v60 = vpop.f32.mrb[5].mxu1  ;;  %1252 = vtanh.f32 %v593_v59 }
 0x273   : > { %v596_v61 = vpop.f32.mrb[6].mxu1 }
 0x274   : > { %1254 = vtanh.f32 %v596_v61  ;;  %v1119_v62 = vpop.f32.mrb[7].mxu1 }
 0x27c   : > { %v1253_v63 = vpop.eup %1252 }
 0x27e   : > { %v1255_v0 = vpop.eup %1254 }
 0x27f   : > { %v604_v2 = vpack.c.bf16 %v1255_v0, %v1253_v63 }
 0x281   : > { %798 = vmatmul.mubr.bf16.vlgmr.msra.gmra.mrb[0].mxu0 %v604_v2 }
 0x282   : > { %1121 = vmatpush3.bf16.msra.mxu0 %v1238_v1  ;;  %1136 = vmatprep.mubr.msk.bf16.mxu0 %vm1334_vm2, %v1333_v11 }
 0x283   : > { %1122 = vmatprep.subr.bf16.mxu0 %v1333_v11 }
 0x286   : > { %1123 = vmatpush3.bf16.msra.mxu0 %v1239_v3 }
 0x287   : > { %1124 = vmatprep.subr.bf16.mxu0 %v1333_v11 }
 0x28a   : > { %1125 = vmatpush3.bf16.msra.mxu0 %v1240_v4 }
 0x28b   : > { %1126 = vmatprep.subr.bf16.mxu0 %v1333_v11 }
 0x28e   : > { %1127 = vmatpush3.bf16.msra.mxu0 %v1241_v5 }
 0x28f   : > { %1128 = vmatprep.subr.bf16.mxu0 %v1333_v11 }
 0x292   : > { %1129 = vmatpush3.bf16.msra.mxu0 %v1242_v6 }
 0x293   : > { %1130 = vmatprep.subr.bf16.mxu0 %v1333_v11 }
 0x296   : > { %1131 = vmatpush3.bf16.msra.mxu0 %v1243_v7 }
 0x297   : > { %1132 = vmatprep.subr.bf16.mxu0 %v1333_v11 }
 0x29a   : > { %1133 = vmatpush3.bf16.msra.mxu0 %v1244_v8 }
 0x29b   : > { %1134 = vmatprep.subr.bf16.mxu0 %v1333_v11 }
 0x29e   : > { %1135 = vmatpush3.bf16.msra.mxu0 %v1245_v9 }
 0x2a1   : > { %1137 = vmatmul.mubr.bf16.vlgmr.msra.gmra.mrb[4].mxu0 %v604_v2 }
 0x354   : > { %v799_v10 = vpop.f32.mrb[0].mxu0 }
 0x355   : > { %1256 = vtanh.f32 %v799_v10  ;;  %v801_v12 = vpop.f32.mrb[1].mxu0 }
 0x356   : > { %1258 = vtanh.f32 %v801_v12  ;;  %v803_v13 = vpop.f32.mrb[2].mxu0 }
 0x357   : > { %1260 = vtanh.f32 %v803_v13  ;;  %v805_v14 = vpop.f32.mrb[3].mxu0 }
 0x358   : > { %1262 = vtanh.f32 %v805_v14 }
 0x35f   : > { %v1257_v15 = vpop.eup %1256 }
 0x360   : > { %v1259_v16 = vpop.eup %1258 }
 0x361   : > { %v1261_v17 = vpop.eup %1260  ;;  %v1044_v18 = vpack.c.bf16 %v1259_v16, %v1257_v15 }
 0x362   : > { %v1263_v19 = vpop.eup %1262 }
 0x363   : > { %875 = vst [vmem:[%s232_s12] sm:$0xff] %v1044_v18  ;;  %v1046_v11 = vpack.c.bf16 %v1263_v19, %v1261_v17 }
 0x365   : > { %878 = vst [vmem:[%s232_s12 + $0xc] sm:$0xff] %v1046_v11 }
 0x374   : > { %v842_v20 = vpop.f32.mrb[4].mxu0 }
 0x375   : > { %1264 = vtanh.f32 %v842_v20  ;;  %v1138_v21 = vpop.f32.mrb[5].mxu0 }
 0x376   : > { %v845_v22 = vpop.f32.mrb[6].mxu0 }
 0x377   : > { %1266 = vtanh.f32 %v845_v22  ;;  %v1139_v23 = vpop.f32.mrb[7].mxu0 }
 0x37f   : > { %v1265_v24 = vpop.eup %1264 }
 0x380   : > { %v1045_v25 = vpack.c.bf16 %v1265_v24, %v1265_v24 }
 0x381   : > { %v1267_v26 = vpop.eup %1266 }
 0x382   : > { %877 = vst.msk [vmem:[%s232_s12 + $0x8] sm:$0xf] %vm876_vm6, %v1045_v25  ;;  %v1047_v27 = vpack.c.bf16 %v1267_v26, %v1267_v26 }
 0x384   : > { %879 = vst.msk [vmem:[%s232_s12 + $0x14] sm:$0xf] %vm876_vm6, %v1047_v27 }
 0x385   : > { %1281 = shalt.err (!%p1278_p3)
}
 0x386   : > { %s1282_s6 = scalar_lea.hbm %s1575_s17, 384  ;;  %s1286_s9 = scalar_lea.hbm %s1625_s5, 768 }
 0x387   : > { %p1283_p4 = scmp.ne.s32.totalorder %s1575_s17, %s1282_s6  ;;  %p1287_p9 = scmp.lt.u32.totalorder %s1575_s17, %s1625_s5 }
 0x388   : > { %p1288_p10 = scmp.lt.u32.totalorder %s1286_s9, %s1282_s6  ;;  %p1290_p12 = scmp.lt.u32.totalorder %s1282_s6, %s1575_s17 }
 0x389   : > { %p1284_p7 = pnand %p1283_p4, %p1407_p5 }
 0x38a   : > { %p1289_p11 = por %p1288_p10, %p1287_p9 }
 0x38b   : > { %p1285_p8 = pneg %p1284_p7 }
 0x38c   : > { %p1291_p13 = por %p1290_p12, %p1289_p11 }
 0x38e   : > { %p1292_p0 = pnand %p1291_p13, %p1285_p8 }
 0x390   : > { %1295 = shalt.err (!%p1292_p0)
}
 0x391   : > { %s1337_s12 = smov 192   ;;  %s1338_s13 = smov 12  }
 0x392   : > { %1151 = dma.vmem_to_hbm [thread:$0]  (%p1407_p5), %s1577_s14, 384, %s1575_s17, %s1579_s23, %s1337_s12, %s1337_s12, %s1338_s13  }
 0x393 PF: > { %p1157_p1 = scmp.ge.s32.totalorder %s1330_s21, 2  ;;  %s909_s15 = sand.u32 1, %s1318_s18  }
 0x394   : > { %s910_s16 = scalar_lea.sflag [#allocation3], %s909_s15 }
 0x395   : > { %p1154_p2 = pnand %p1157_p1, %p1411_p6 }
 0x397   : > { %1313 = dma.done.wait (!%p1154_p2), %s910_s16, 384  }
 0x398   : > { %1315 = vsyncadd (!%p1154_p2), %s910_s16, 4294966912  ;;  %p15_p3 = scmp.ge.s32.totalorder %s1394_s24, 4   ;;  %s1628_s18 = smov %s1322_s19 }
 0x399   : > { %s1629_s19 = smov %s1326_s20  ;;  %s1630_s20 = smov %s1405_s27 }
 0x39a   : > { %s1631_s21 = smov %s1394_s24  ;;  %17 = sbr.rel (!%p15_p3) target bundleno = 3 (0x3), region = 80 }
 0x3a1   :  { %915 = vsyncpa [#allocation3], 1 }
 0x3a2   :  { %917 = vsyncpa [#allocation3 + $0x1], 1 }

</bundles_post_ra>
